<compile_context>
chip_gen: v5e
topology: v5e:2x2
jax: 0.10.0
libtpu: 0.0.40
codegen_flags: <defaults>
</compile_context>

<pallas_src>
import jax
import jax.numpy as jnp
from jax.experimental import pallas as pl
from jax.experimental.pallas import tpu as pltpu


def _make_outconv_kernel(c_in, c_out):
    def kernel(w_ref, b_ref, x_ref, o_ref):
        # w_ref: (c_out*c_in,) f32 in SMEM (row-major [co, ci])
        # b_ref: (c_out,)      f32 in SMEM
        # x_ref: (c_in, T)     in VMEM   (T = spatial tile, lane-dense)
        # o_ref: (c_out, T)    in VMEM   (lane-dense stores)
        rows = [
            x_ref[pl.ds(ci, 1), :].astype(jnp.float32)  # (1, T)
            for ci in range(c_in)
        ]
        for co in range(c_out):
            acc = rows[0] * w_ref[co * c_in + 0] + b_ref[co]
            for ci in range(1, c_in):
                acc = acc + rows[ci] * w_ref[co * c_in + ci]
            o_ref[pl.ds(co, 1), :] = acc.astype(o_ref.dtype)

    return kernel


def out_conv(x_nchw, weight, bias, *, vmem_budget_bytes=8 * 1024 * 1024):
    """1x1 Conv2d forward (PyTorch OutConv semantics).

    x_nchw : (N, C_in, H, W)
    weight : (C_out, C_in, 1, 1)   -- PyTorch Conv2d weight layout
    bias   : (C_out,)
    returns (N, C_out, H, W)
    """
    N, C_in, H, W = x_nchw.shape
    C_out = weight.shape[0]
    HW = H * W

    # Free, contiguous reshapes — no transpose glue.
    x_rows = x_nchw.reshape(N, C_in, HW)                      # (N, C_in, HW)
    w_flat = weight.reshape(C_out * C_in).astype(jnp.float32)  # [co*C_in + ci]
    b_flat = bias.reshape(C_out).astype(jnp.float32)

    # Largest spatial tile that fits double-buffered input+output in a
    # conservative VMEM budget (safe on v5e's 16 MiB scoped default).
    bytes_per = 4
    cap = max(128, vmem_budget_bytes // (2 * (C_in + C_out) * bytes_per))
    if HW <= cap:
        tile_hw = HW                              # full-extent block: always legal
    else:
        tile_hw = max(128, (cap // 128) * 128)    # multiple of 128 per (8,128) rule

    grid = (N, pl.cdiv(HW, tile_hw))

    kernel = _make_outconv_kernel(C_in, C_out)

    y = pl.pallas_call(
        kernel,
        out_shape=jax.ShapeDtypeStruct((N, C_out, HW), x_nchw.dtype),
        grid_spec=pltpu.PrefetchScalarGridSpec(
            num_scalar_prefetch=0,
            grid=grid,
            in_specs=[
                # Small weight/bias tables live in SMEM; read as scalars.
                pl.BlockSpec(memory_space=pltpu.MemorySpace.SMEM),
                pl.BlockSpec(memory_space=pltpu.MemorySpace.SMEM),
                # x: one batch image, all input channels, a lane-dense spatial slab.
                pl.BlockSpec((None, C_in, tile_hw), lambda n, t: (n, 0, t)),
            ],
            out_specs=pl.BlockSpec((None, C_out, tile_hw), lambda n, t: (n, 0, t)),
        ),
        compiler_params=pltpu.CompilerParams(
            dimension_semantics=("parallel", "parallel"),
        ),
    )(w_flat, b_flat, x_rows)

    return y.reshape(N, C_out, H, W)


if __name__ == "__main__":
    # Module config (synthetic, deterministic init).
    in_channels, out_channels = 4, 3
    N, H, Wd = 2, 16, 16

    key = jax.random.PRNGKey(0)
    kx, kw, kb = jax.random.split(key, 3)

    x = jax.random.normal(kx, (N, in_channels, H, Wd), dtype=jnp.float32)
    # nn.Conv2d(in_channels, out_channels, kernel_size=1) parameter shapes:
    weight = jax.random.normal(kw, (out_channels, in_channels, 1, 1), dtype=jnp.float32) * 0.1
    bias = jax.random.normal(kb, (out_channels,), dtype=jnp.float32) * 0.1

    out_conv_jit = jax.jit(out_conv)
    y = out_conv_jit(x, weight, bias)
    y = jax.block_until_ready(y)

    # Reference check against plain-JAX 1x1 conv semantics.
    ref = jnp.einsum("nchw,oc->nohw", x, weight.reshape(out_channels, in_channels)) \
          + bias.reshape(1, out_channels, 1, 1)
    assert y.shape == (N, out_channels, H, Wd)
    assert jnp.allclose(y, ref, atol=1e-5, rtol=1e-5)

    print("KERNEL_OK")
</pallas_src>

<mosaic_0001>
module attributes {stable_mosaic.version = 11 : i64} {
  func.func @kernel(%arg0: i32, %arg1: i32, %arg2: memref<12xf32, #tpu.memory_space<smem>>, %arg3: memref<3xf32, #tpu.memory_space<smem>>, %arg4: memref<1x4x256xf32, #tpu.memory_space<vmem>>, %arg5: memref<1x3x256xf32, #tpu.memory_space<vmem>>) attributes {dimension_semantics = [#tpu.dimension_semantics<parallel>, #tpu.dimension_semantics<parallel>], iteration_bounds = array<i64: 2, 1>, scalar_prefetch = 0 : i64, scratch_operands = 0 : i64, tpu.core_type = #tpu.core_type<tc>, window_params = [{transform_indices = @transform_0, window_bounds = array<i64: 12>}, {transform_indices = @transform_1, window_bounds = array<i64: 3>}, {transform_indices = @transform_2, window_bounds = array<i64: 1, 4, 256>}, {transform_indices = @transform_3, window_bounds = array<i64: 1, 3, 256>}]} {
    %c0 = arith.constant 0 : index
    %c0_0 = arith.constant 0 : index
    %c0_1 = arith.constant 0 : index
    %0 = vector.load %arg4[%c0, %c0_0, %c0_1] : memref<1x4x256xf32, #tpu.memory_space<vmem>>, vector<1x1x256xf32>
    %1 = vector.shape_cast %0 : vector<1x1x256xf32> to vector<1x256xf32>
    %c0_2 = arith.constant 0 : index
    %c1 = arith.constant 1 : index
    %c0_3 = arith.constant 0 : index
    %2 = vector.load %arg4[%c0_2, %c1, %c0_3] : memref<1x4x256xf32, #tpu.memory_space<vmem>>, vector<1x1x256xf32>
    %3 = vector.shape_cast %2 : vector<1x1x256xf32> to vector<1x256xf32>
    %c0_4 = arith.constant 0 : index
    %c2 = arith.constant 2 : index
    %c0_5 = arith.constant 0 : index
    %4 = vector.load %arg4[%c0_4, %c2, %c0_5] : memref<1x4x256xf32, #tpu.memory_space<vmem>>, vector<1x1x256xf32>
    %5 = vector.shape_cast %4 : vector<1x1x256xf32> to vector<1x256xf32>
    %c0_6 = arith.constant 0 : index
    %c3 = arith.constant 3 : index
    %c0_7 = arith.constant 0 : index
    %6 = vector.load %arg4[%c0_6, %c3, %c0_7] : memref<1x4x256xf32, #tpu.memory_space<vmem>>, vector<1x1x256xf32>
    %7 = vector.shape_cast %6 : vector<1x1x256xf32> to vector<1x256xf32>
    %c0_8 = arith.constant 0 : index
    %8 = memref.load %arg2[%c0_8] : memref<12xf32, #tpu.memory_space<smem>>
    %9 = vector.broadcast %8 : f32 to vector<1x256xf32>
    %10 = arith.mulf %1, %9 : vector<1x256xf32>
    %c0_9 = arith.constant 0 : index
    %11 = memref.load %arg3[%c0_9] : memref<3xf32, #tpu.memory_space<smem>>
    %12 = vector.broadcast %11 : f32 to vector<1x256xf32>
    %13 = arith.addf %10, %12 : vector<1x256xf32>
    %c1_10 = arith.constant 1 : index
    %14 = memref.load %arg2[%c1_10] : memref<12xf32, #tpu.memory_space<smem>>
    %15 = vector.broadcast %14 : f32 to vector<1x256xf32>
    %16 = arith.mulf %3, %15 : vector<1x256xf32>
    %17 = arith.addf %13, %16 : vector<1x256xf32>
    %c2_11 = arith.constant 2 : index
    %18 = memref.load %arg2[%c2_11] : memref<12xf32, #tpu.memory_space<smem>>
    %19 = vector.broadcast %18 : f32 to vector<1x256xf32>
    %20 = arith.mulf %5, %19 : vector<1x256xf32>
    %21 = arith.addf %17, %20 : vector<1x256xf32>
    %c3_12 = arith.constant 3 : index
    %22 = memref.load %arg2[%c3_12] : memref<12xf32, #tpu.memory_space<smem>>
    %23 = vector.broadcast %22 : f32 to vector<1x256xf32>
    %24 = arith.mulf %7, %23 : vector<1x256xf32>
    %25 = arith.addf %21, %24 : vector<1x256xf32>
    %c0_13 = arith.constant 0 : index
    %c0_14 = arith.constant 0 : index
    %c0_15 = arith.constant 0 : index
    %26 = vector.load %arg5[%c0_13, %c0_14, %c0_15] : memref<1x3x256xf32, #tpu.memory_space<vmem>>, vector<1x1x256xf32>
    %27 = vector.shape_cast %26 : vector<1x1x256xf32> to vector<1x256xf32>
    %28 = vector.shape_cast %25 : vector<1x256xf32> to vector<1x1x256xf32>
    tpu.vector_store %arg5[%c0_13, %c0_14, %c0_15], %28 {strides = array<i32>} : memref<1x3x256xf32, #tpu.memory_space<vmem>>, vector<1x1x256xf32>,
    %c4 = arith.constant 4 : index
    %29 = memref.load %arg2[%c4] : memref<12xf32, #tpu.memory_space<smem>>
    %30 = vector.broadcast %29 : f32 to vector<1x256xf32>
    %31 = arith.mulf %1, %30 : vector<1x256xf32>
    %c1_16 = arith.constant 1 : index
    %32 = memref.load %arg3[%c1_16] : memref<3xf32, #tpu.memory_space<smem>>
    %33 = vector.broadcast %32 : f32 to vector<1x256xf32>
    %34 = arith.addf %31, %33 : vector<1x256xf32>
    %c5 = arith.constant 5 : index
    %35 = memref.load %arg2[%c5] : memref<12xf32, #tpu.memory_space<smem>>
    %36 = vector.broadcast %35 : f32 to vector<1x256xf32>
    %37 = arith.mulf %3, %36 : vector<1x256xf32>
    %38 = arith.addf %34, %37 : vector<1x256xf32>
    %c6 = arith.constant 6 : index
    %39 = memref.load %arg2[%c6] : memref<12xf32, #tpu.memory_space<smem>>
    %40 = vector.broadcast %39 : f32 to vector<1x256xf32>
    %41 = arith.mulf %5, %40 : vector<1x256xf32>
    %42 = arith.addf %38, %41 : vector<1x256xf32>
    %c7 = arith.constant 7 : index
    %43 = memref.load %arg2[%c7] : memref<12xf32, #tpu.memory_space<smem>>
    %44 = vector.broadcast %43 : f32 to vector<1x256xf32>
    %45 = arith.mulf %7, %44 : vector<1x256xf32>
    %46 = arith.addf %42, %45 : vector<1x256xf32>
    %c0_17 = arith.constant 0 : index
    %c1_18 = arith.constant 1 : index
    %c0_19 = arith.constant 0 : index
    %47 = vector.load %arg5[%c0_17, %c1_18, %c0_19] : memref<1x3x256xf32, #tpu.memory_space<vmem>>, vector<1x1x256xf32>
    %48 = vector.shape_cast %47 : vector<1x1x256xf32> to vector<1x256xf32>
    %49 = vector.shape_cast %46 : vector<1x256xf32> to vector<1x1x256xf32>
    tpu.vector_store %arg5[%c0_17, %c1_18, %c0_19], %49 {strides = array<i32>} : memref<1x3x256xf32, #tpu.memory_space<vmem>>, vector<1x1x256xf32>,
    %c8 = arith.constant 8 : index
    %50 = memref.load %arg2[%c8] : memref<12xf32, #tpu.memory_space<smem>>
    %51 = vector.broadcast %50 : f32 to vector<1x256xf32>
    %52 = arith.mulf %1, %51 : vector<1x256xf32>
    %c2_20 = arith.constant 2 : index
    %53 = memref.load %arg3[%c2_20] : memref<3xf32, #tpu.memory_space<smem>>
    %54 = vector.broadcast %53 : f32 to vector<1x256xf32>
    %55 = arith.addf %52, %54 : vector<1x256xf32>
    %c9 = arith.constant 9 : index
    %56 = memref.load %arg2[%c9] : memref<12xf32, #tpu.memory_space<smem>>
    %57 = vector.broadcast %56 : f32 to vector<1x256xf32>
    %58 = arith.mulf %3, %57 : vector<1x256xf32>
    %59 = arith.addf %55, %58 : vector<1x256xf32>
    %c10 = arith.constant 10 : index
    %60 = memref.load %arg2[%c10] : memref<12xf32, #tpu.memory_space<smem>>
    %61 = vector.broadcast %60 : f32 to vector<1x256xf32>
    %62 = arith.mulf %5, %61 : vector<1x256xf32>
    %63 = arith.addf %59, %62 : vector<1x256xf32>
    %c11 = arith.constant 11 : index
    %64 = memref.load %arg2[%c11] : memref<12xf32, #tpu.memory_space<smem>>
    %65 = vector.broadcast %64 : f32 to vector<1x256xf32>
    %66 = arith.mulf %7, %65 : vector<1x256xf32>
    %67 = arith.addf %63, %66 : vector<1x256xf32>
    %c0_21 = arith.constant 0 : index
    %c2_22 = arith.constant 2 : index
    %c0_23 = arith.constant 0 : index
    %68 = vector.load %arg5[%c0_21, %c2_22, %c0_23] : memref<1x3x256xf32, #tpu.memory_space<vmem>>, vector<1x1x256xf32>
    %69 = vector.shape_cast %68 : vector<1x1x256xf32> to vector<1x256xf32>
    %70 = vector.shape_cast %67 : vector<1x256xf32> to vector<1x1x256xf32>
    tpu.vector_store %arg5[%c0_21, %c2_22, %c0_23], %70 {strides = array<i32>} : memref<1x3x256xf32, #tpu.memory_space<vmem>>, vector<1x1x256xf32>,
    return
  }
  func.func @transform_0(%arg0: i32, %arg1: i32) -> i32 {
    %c0_i32 = arith.constant 0 : i32
    %c0_i32_0 = arith.constant 0 : i32
    return %c0_i32 : i32
  }
  func.func @transform_1(%arg0: i32, %arg1: i32) -> i32 {
    %c0_i32 = arith.constant 0 : i32
    %c0_i32_0 = arith.constant 0 : i32
    return %c0_i32 : i32
  }
  func.func @transform_2(%arg0: i32, %arg1: i32) -> (i32, i32, i32) {
    %c0_i32 = arith.constant 0 : i32
    %c0_i32_0 = arith.constant 0 : i32
    return %arg0, %c0_i32, %arg1 : i32, i32, i32
  }
  func.func @transform_3(%arg0: i32, %arg1: i32) -> (i32, i32, i32) {
    %c0_i32 = arith.constant 0 : i32
    %c0_i32_0 = arith.constant 0 : i32
    return %arg0, %c0_i32, %arg1 : i32, i32, i32
  }
}

</mosaic_0001>

<bundles_post_ra>
// kernel: out_conv.1
= control target key start
LH: loop header
LB: loop body
LE: loop exit
PB: predicated region body
PF: predicated region fallthrough
CT: control target
= control target key end

     0   :  { %8 = vsyncpa [#allocation3], 0  ;;  %s660_s0 = inlined_call_operand.vmem [shape: f32[12], index: 0, kind: input, shape index: {}]   ;;  %s661_s1 = inlined_call_operand.vmem [shape: f32[3], index: 1, kind: input, shape index: {}]   ;;  %s662_s2 = inlined_call_operand.vmem [shape: f32[2,4,256], index: 2, kind: input, shape index: {}]   ;;  %s663_s3 = inlined_call_operand.vmem [shape: f32[2,3,256], index: 3, kind: output, shape index: {}]  }
   0x1   :  { %9 = vsyncpa [#allocation5], 0  ;;  %s580_s12 = smov 0   ;;  %s582_s13 = smov 0  }
   0x2   :  { %s584_s14 = smov 0  }
   0x3 LB: > { %s416_s15 = sadd.s32 4294967295, %s556_s14   ;;  %s27_s16 = sadd.s32 1, %s552_s13  ;;  %s556_s14 = sphi %s584_s14, %s15_s14   ;;  %s552_s13 = sphi %s582_s13, %s668_s13   ;;  %s548_s12 = sphi %s580_s12, %s667_s12  }
   0x4   : > { %p29_p0 = scmp.ge.s32.totalorder %s27_s16, 2  ;;  %p418_p1 = scmp.ge.s32.totalorder %s556_s14, 1 }
   0x5   : > { %p130_p2 = scmp.lt.s32.totalorder %s556_s14, 3  ;;  %p601_p4 = scmp.eq.s32.totalorder %s416_s15, 0 }
   0x6   : > { %s670_s16 = smov (%p29_p0, %s27_s16), 0  ;;  %s142_s20 = sshll.u32 %s660_s0, 4  ;;  %s143_s20 = int_to_ptr.vmem [resolvable:$true] %s142_s20 }
   0x7   : > { %p131_p3 = pnand %p418_p1, %p130_p2  ;;  %s152_s23 = sshll.u32 %s661_s1, 4  ;;  %s153_s23 = int_to_ptr.vmem [resolvable:$true] %s152_s23 }
   0x8   : > { %s558_s24 = smov [#allocation2]   ;;  %s559_s25 = smov [#allocation4]  }
   0x9   : > { %p459_p5 = pneg %p131_p3 }
   0xa   : > { %178 = sbr.rel (%p131_p3) target bundleno = 49 (0x31), region = 32 }
   0xb   : > { %p460_p6 = pnand %p601_p4, %p459_p5 }
   0xd   : > { %462 = dma.vmem_to_smem (!%p460_p6), %s143_s20, 16, %s558_s24, [#allocation3]  }
   0xe   : > { %465 = dma.vmem_to_smem (!%p460_p6), %s153_s23, 16, %s559_s25, [#allocation5]  }
   0xf   : > { %539 = dma.done.wait (%p601_p4), [#allocation3], 16  }
  0x10   : > { %541 = vsyncadd (%p601_p4), [#allocation3], 4294967280 }
  0x11   : > { %543 = dma.done.wait (%p601_p4), [#allocation5], 16  }
  0x12   : > { %545 = vsyncadd (%p601_p4), [#allocation5], 4294967280 }
  0x13   : > { %190 = sfence }
  0x14   : > { %p218_p7 = scmp.lt.s32.totalorder %s548_s12, 1  ;;  %s244_s26 = sld [smem:[#allocation2]]  ;;  %v262_v13 = vlaneseq }
  0x15   : > { %s247_s27 = sld [smem:[#allocation4]] }
  0x16   : > { %s672_s12 = smov (!%p218_p7, %s548_s12), 1  ;;  %s432_s28 = sld [smem:[#allocation2 + $0x1]]  ;;  %vm638_vm0 = vcmp.lt.s32.totalorder %v262_v13, 256 }
  0x17   : > { %s449_s29 = sshll.u32 %s672_s12, 3  ;;  %s433_s30 = sld [smem:[#allocation2 + $0x2]] }
  0x18   : > { %s225_s6 = scalar_lea.vmem %s662_s2, %s449_s29  ;;  %s434_s7 = sld [smem:[#allocation2 + $0x3]] }
  0x19   : > { %v237_v0 = vld [vmem:[%s225_s6] ss:$4 sm:$0x3]  ;;  %v429_v2 = vld [vmem:[%s225_s6 + $0x1] ss:$4 sm:$0x3]  ;;  %s636_s21 = scalar_lea.vmem %s663_s3, %s449_s29 }
  0x1a   : > { %v245_v1 = vstv %s244_s26  ;;  %v430_v5 = vld [vmem:[%s225_s6 + $0x2] ss:$4 sm:$0x3]  ;;  %s435_s8 = sld [smem:[#allocation2 + $0x4]] }
  0x1b   : > { %v246_v3 = vmul.f32 %v245_v1, %v237_v0  ;;  %v248_v4 = vstv %s247_s27  ;;  %s441_s9 = sld [smem:[#allocation2 + $0x8]]  ;;  %v431_v11 = vld [vmem:[%s225_s6 + $0x3] ss:$4 sm:$0x3] }
  0x1c   : > { %v251_v7 = vstv %s432_s28  ;;  %s436_s10 = sld [smem:[#allocation4 + $0x1]] }
  0x1d   : > { %v249_v6 = vadd.f32 %v248_v4, %v246_v3  ;;  %v252_v8 = vmul.f32 %v429_v2, %v251_v7  ;;  %v255_v9 = vstv %s433_s30  ;;  %s437_s11 = sld [smem:[#allocation2 + $0x5]] }
  0x1e   : > { %v256_v10 = vmul.f32 %v430_v5, %v255_v9  ;;  %s438_s15 = sld [smem:[#allocation2 + $0x6]]  ;;  %v259_v15 = vstv %s434_s7 }
  0x1f   : > { %v253_v12 = vadd.f32 %v252_v8, %v249_v6  ;;  %s439_s17 = sld [smem:[#allocation2 + $0x7]]  ;;  %v260_v16 = vmul.f32 %v431_v11, %v259_v15 }
  0x20   : > { %v268_v17 = vstv %s435_s8  ;;  %s442_s18 = sld [smem:[#allocation4 + $0x2]] }
  0x21   : > { %v257_v14 = vadd.f32 %v256_v10, %v253_v12  ;;  %v269_v19 = vmul.f32 %v268_v17, %v237_v0  ;;  %v288_v20 = vstv %s441_s9  ;;  %s443_s22 = sld [smem:[#allocation2 + $0x9]] }
  0x22   : > { %v271_v22 = vstv %s436_s10  ;;  %s444_s23 = sld [smem:[#allocation2 + $0xa]]  ;;  %v289_v23 = vmul.f32 %v288_v20, %v237_v0 }
  0x23   : > { %v261_v21 = vadd.f32 %v260_v16, %v257_v14  ;;  %v272_v24 = vadd.f32 %v271_v22, %v269_v19  ;;  %v274_v25 = vstv %s437_s11  ;;  %s445_s12 = sld [smem:[#allocation2 + $0xb]] }
  0x24   : > { %v275_v26 = vmul.f32 %v429_v2, %v274_v25  ;;  %v278_v27 = vstv %s438_s15 }
  0x25   : > { %266 = vst.msk [vmem:[%s636_s21] ss:$4 sm:$0x3] %vm638_vm0, %v261_v21  ;;  %v279_v28 = vmul.f32 %v430_v5, %v278_v27  ;;  %v282_v29 = vstv %s439_s17 }
  0x26   : > { %v276_v30 = vadd.f32 %v275_v26, %v272_v24  ;;  %v283_v31 = vmul.f32 %v431_v11, %v282_v29  ;;  %v291_v32 = vstv %s442_s18 }
  0x27   : > { %v292_v33 = vadd.f32 %v291_v32, %v289_v23  ;;  %v294_v34 = vstv %s443_s22 }
  0x28   : > { %v280_v35 = vadd.f32 %v279_v28, %v276_v30  ;;  %v295_v36 = vmul.f32 %v429_v2, %v294_v34  ;;  %v298_v37 = vstv %s444_s23 }
  0x29   : > { %v299_v38 = vmul.f32 %v430_v5, %v298_v37  ;;  %v302_v39 = vstv %s445_s12 }
  0x2a   : > { %v284_v40 = vadd.f32 %v283_v31, %v280_v35  ;;  %v296_v41 = vadd.f32 %v295_v36, %v292_v33  ;;  %v303_v42 = vmul.f32 %v431_v11, %v302_v39 }
  0x2c   : > { %440 = vst.msk [vmem:[%s636_s21 + $0x1] ss:$4 sm:$0x3] %vm638_vm0, %v284_v40  ;;  %v300_v43 = vadd.f32 %v299_v38, %v296_v41 }
  0x2e   : > { %v304_v44 = vadd.f32 %v303_v42, %v300_v43 }
  0x30   : > { %446 = vst.msk [vmem:[%s636_s21 + $0x2] ss:$4 sm:$0x3] %vm638_vm0, %v304_v44 }
  0x31 PF: > { %s15_s14 = sadd.s32 1, %s556_s14   ;;  %s667_s12 = smov %s552_s13 }
  0x32   : > { %p12_p8 = scmp.ge.s32.totalorder %s15_s14, 4   ;;  %s668_s13 = smov %s670_s16 }
  0x34   :  { %14 = sbr.rel (!%p12_p8) target bundleno = 3 (0x3), region = 76 }
  0x39   :  { %337 = vsyncpa [#allocation3], 1 }
  0x3a   :  { %339 = vsyncpa [#allocation3 + $0x1], 1 }
  0x3b   :  { %340 = vsyncpa [#allocation5], 1 }

</bundles_post_ra>
